<compile_context>
chip_gen: v6e
topology: v6e:2x2x1
jax: 0.10.0
libtpu: 0.0.40
codegen_flags: <defaults>
</compile_context>

<pallas_src>
import functools

import jax
import jax.numpy as jnp
from jax.experimental import pallas as pl
from jax.experimental.pallas import tpu as pltpu


_LANE = 128


def _round_up(x, m):
    return (x + m - 1) // m * m


def _vmem_config():
    """Generation-aware (tile_budget_bytes, vmem_limit_bytes)."""
    try:
        cap = pltpu.get_tpu_info().vmem_capacity_bytes
    except Exception:
        cap = 64 * 1024 * 1024  # assume smallest (v7x per-TC) if unknown
    if cap >= 96 * 1024 * 1024:          # v5e / v6e: 128 MiB physical VMEM
        return 24 * 1024 * 1024, 64 * 1024 * 1024
    else:                                # v7x: 64 MiB per TC -> stay well under
        return 8 * 1024 * 1024, 40 * 1024 * 1024


def _choose_hw_tile(hw, n, per_lane_bytes, budget):
    """Largest lane-multiple HW tile under the VMEM budget.

    No rounding of HW up to a tile multiple -- the ragged last tile is masked
    (pool) or write-clipped (gate) instead, so no padding traffic is added.
    """
    hw_lanes = _round_up(hw, _LANE)
    t = (budget // max(per_lane_bytes, 1)) // _LANE * _LANE
    t = max(_LANE, min(t, hw_lanes))
    # With N < 2, keep >= 2 HW tiles so the "parallel" HW axis can shard
    # across v7x's two TensorCores.
    if n < 2 and hw_lanes >= 2 * _LANE:
        t = min(t, _round_up(-(-hw // 2), _LANE))
    return int(t)


def _pool_sum_kernel(x_ref, psum_ref, *, hw, t, ragged):
    # x_ref: (C, t) tile of one batch element; psum_ref: (C, 1) f32 partial sum
    # for this (n, hw-tile) grid point (independent per step -> fully parallel).
    xt = x_ref[...].astype(jnp.float32)
    if ragged:
        i = pl.program_id(1)
        lane = jax.lax.broadcasted_iota(jnp.int32, xt.shape, dimension=1)
        xt = jnp.where(lane < (hw - i * t), xt, 0.0)   # mask OOB garbage lanes
    psum_ref[...] = jnp.sum(xt, axis=-1, keepdims=True)


def _gate_mul_kernel(gate_ref, x_ref, o_ref):
    # gate_ref: (C, 1) in x.dtype (pre-cast in glue); x_ref/o_ref: (C, t).
    o_ref[...] = gate_ref[...] * x_ref[...]


def attention_refinement_module(x, conv_w, conv_b, bn_gamma, bn_beta,
                                bn_mean, bn_var, *, eps=1e-5, last_arm=False):
    """x: (N, C, H, W). conv_w: (C, C, 1, 1). conv_b / bn_*: (C,)."""
    N, C, H, W = x.shape
    HW = H * W
    xf = x.reshape(N, C, HW)          # contiguous reshape: no copy, no padding
    itemsize = x.dtype.itemsize
    budget, vmem_limit = _vmem_config()

    # ---- kernel 1: per-(n, hw-tile) partial channel sums --------------------
    # double-buffered input tile + allowance for the in-kernel f32 upcast/mask
    pool_per_lane = 2 * C * itemsize + 8 * C
    tp = _choose_hw_tile(HW, N, pool_per_lane, budget)
    n_hw_p = -(-HW // tp)
    pool_kernel = functools.partial(
        _pool_sum_kernel, hw=HW, t=tp, ragged=(HW % tp != 0))
    psums = pl.pallas_call(
        pool_kernel,
        out_shape=jax.ShapeDtypeStruct((N, n_hw_p, C, 1), jnp.float32),
        grid=(N, n_hw_p),
        in_specs=[pl.BlockSpec((None, C, tp), lambda n, i: (n, 0, i))],
        out_specs=pl.BlockSpec((None, None, C, 1), lambda n, i: (n, i, 0, 0)),
        compiler_params=pltpu.CompilerParams(
            dimension_semantics=("parallel", "parallel"),
            vmem_limit_bytes=vmem_limit),
    )(xf)

    # ---- tiny O(N*C^2) gate math in plain JAX (batched over N) --------------
    pooled = jnp.sum(psums[..., 0], axis=1) / float(HW)          # (N, C) f32
    scale = bn_gamma / jnp.sqrt(bn_var + eps)                    # fold BN
    w_fused = (scale[:, None] * conv_w.reshape(C, C)).astype(jnp.float32)
    b_fused = (scale * conv_b + (bn_beta - bn_mean * scale)).astype(jnp.float32)
    weights = jax.nn.sigmoid(pooled @ w_fused.T + b_fused)       # (N, C)
    if last_arm:
        # mean(weights*x) over HW == weights * pooled, so the second gating
        # pass collapses to a per-channel scalar: gate = weights^2 * pooled.
        gate = weights * weights * pooled
    else:
        gate = weights
    gate = gate.astype(x.dtype)[:, :, None]                      # (N, C, 1)

    # ---- kernel 2: streaming lane-dense gating multiply ----------------------
    gate_per_lane = 5 * C * itemsize   # in + out double-buffered + one temp
    tg = _choose_hw_tile(HW, N, gate_per_lane, budget)
    n_hw_g = -(-HW // tg)
    out = pl.pallas_call(
        _gate_mul_kernel,
        out_shape=jax.ShapeDtypeStruct((N, C, HW), x.dtype),     # exact shape:
        grid=(N, n_hw_g),                                        # edge writes clipped
        in_specs=[
            pl.BlockSpec((None, C, 1), lambda n, i: (n, 0, 0)),    # gate
            pl.BlockSpec((None, C, tg), lambda n, i: (n, 0, i)),   # x tile
        ],
        out_specs=pl.BlockSpec((None, C, tg), lambda n, i: (n, 0, i)),
        compiler_params=pltpu.CompilerParams(
            dimension_semantics=("parallel", "parallel"),
            vmem_limit_bytes=vmem_limit),
    )(gate, xf)

    return out.reshape(N, C, H, W)


def _reference(x, conv_w, conv_b, bn_gamma, bn_beta, bn_mean, bn_var,
               *, eps=1e-5, last_arm=False):
    # Pure-JAX reference mirroring the PyTorch forward (eval-mode BN).
    C = x.shape[1]
    pooled = jnp.mean(x, axis=(2, 3), keepdims=True)                 # (N,C,1,1)
    y = jnp.einsum('oi,nihw->nohw', conv_w.reshape(C, C), pooled)
    y = y + conv_b[None, :, None, None]
    scale = bn_gamma / jnp.sqrt(bn_var + eps)
    shift = bn_beta - bn_mean * scale
    y = y * scale[None, :, None, None] + shift[None, :, None, None]
    w = jax.nn.sigmoid(y)
    out = w * x
    if last_arm:
        w2 = jnp.mean(out, axis=(2, 3), keepdims=True)
        out = w2 * out
    return out


if __name__ == "__main__":
    key = jax.random.PRNGKey(0)
    k_x, k_w, k_b, k_g, k_be, k_m, k_v = jax.random.split(key, 7)

    N, C, H, W = 2, 4, 16, 16
    x = jax.random.normal(k_x, (N, C, H, W), dtype=jnp.float32)

    conv_w = jax.random.normal(k_w, (C, C, 1, 1), dtype=jnp.float32) * 0.1
    conv_b = jax.random.normal(k_b, (C,), dtype=jnp.float32) * 0.1
    bn_gamma = 1.0 + 0.1 * jax.random.normal(k_g, (C,), dtype=jnp.float32)
    bn_beta = 0.1 * jax.random.normal(k_be, (C,), dtype=jnp.float32)
    bn_mean = 0.1 * jax.random.normal(k_m, (C,), dtype=jnp.float32)
    bn_var = jnp.abs(jax.random.normal(k_v, (C,), dtype=jnp.float32)) + 0.5

    ok = True
    for last_arm in (False, True):
        out = attention_refinement_module(
            x, conv_w, conv_b, bn_gamma, bn_beta, bn_mean, bn_var,
            last_arm=last_arm)
        out = jax.block_until_ready(out)
        ref = _reference(x, conv_w, conv_b, bn_gamma, bn_beta, bn_mean, bn_var,
                         last_arm=last_arm)
        if not jnp.allclose(out, ref, atol=1e-5, rtol=1e-5):
            ok = False
            print(f"MISMATCH (last_arm={last_arm}): "
                  f"max abs err = {float(jnp.max(jnp.abs(out - ref)))}")

    if ok:
        print("KERNEL_OK")
</pallas_src>

<mosaic_0001>
module attributes {stable_mosaic.version = 11 : i64} {
  func.func @_pool_sum_kernel(%arg0: i32, %arg1: i32, %arg2: memref<1x4x256xf32, #tpu.memory_space<vmem>>, %arg3: memref<1x1x4x1xf32, #tpu.memory_space<vmem>>) attributes {dimension_semantics = [#tpu.dimension_semantics<parallel>, #tpu.dimension_semantics<parallel>], iteration_bounds = array<i64: 2, 1>, scalar_prefetch = 0 : i64, scratch_operands = 0 : i64, tpu.core_type = #tpu.core_type<tc>, window_params = [{transform_indices = @transform_0, window_bounds = array<i64: 1, 4, 256>}, {transform_indices = @transform_1, window_bounds = array<i64: 1, 1, 4, 1>}]} {
    %c0 = arith.constant 0 : index
    %c0_0 = arith.constant 0 : index
    %c0_1 = arith.constant 0 : index
    %0 = vector.load %arg2[%c0, %c0_0, %c0_1] : memref<1x4x256xf32, #tpu.memory_space<vmem>>, vector<1x4x256xf32>
    %1 = vector.shape_cast %0 : vector<1x4x256xf32> to vector<4x256xf32>
    %cst = arith.constant dense<0.000000e+00> : vector<4xf32>
    %2 = vector.multi_reduction <add>, %1, %cst [1] : vector<4x256xf32> to vector<4xf32>
    %3 = vector.shape_cast %2 : vector<4xf32> to vector<4x1xf32>
    %c0_2 = arith.constant 0 : index
    %c0_3 = arith.constant 0 : index
    %c0_4 = arith.constant 0 : index
    %c0_5 = arith.constant 0 : index
    %4 = vector.load %arg3[%c0_2, %c0_3, %c0_4, %c0_5] : memref<1x1x4x1xf32, #tpu.memory_space<vmem>>, vector<1x1x4x1xf32>
    %5 = vector.shape_cast %4 : vector<1x1x4x1xf32> to vector<4x1xf32>
    %6 = vector.shape_cast %3 : vector<4x1xf32> to vector<1x1x4x1xf32>
    tpu.vector_store %arg3[%c0_2, %c0_3, %c0_4, %c0_5], %6 {strides = array<i32>} : memref<1x1x4x1xf32, #tpu.memory_space<vmem>>, vector<1x1x4x1xf32>,
    return
  }
  func.func @transform_0(%arg0: i32, %arg1: i32) -> (i32, i32, i32) {
    %c0_i32 = arith.constant 0 : i32
    %c0_i32_0 = arith.constant 0 : i32
    return %arg0, %c0_i32, %arg1 : i32, i32, i32
  }
  func.func @transform_1(%arg0: i32, %arg1: i32) -> (i32, i32, i32, i32) {
    %c0_i32 = arith.constant 0 : i32
    %c0_i32_0 = arith.constant 0 : i32
    %c0_i32_1 = arith.constant 0 : i32
    return %arg0, %arg1, %c0_i32, %c0_i32_0 : i32, i32, i32, i32
  }
}

</mosaic_0001>

<bundles_post_ra>
// kernel: tpu_custom_call.1
= control target key start
LH: loop header
LB: loop body
LE: loop exit
PB: predicated region body
PF: predicated region fallthrough
CT: control target
= control target key end

     0   :  { %6 = vsyncpa [#allocation3], 0  ;;  %s516_s0 = inlined_call_operand.hbm [shape: f32[2,4,256], index: 0, kind: input, shape index: {}]   ;;  %s517_s1 = inlined_call_operand.vmem [shape: f32[2,1,4,1], index: 1, kind: output, shape index: {}]  }
   0x1   :  { %8 = vsyncpa [#allocation3 + $0x1], 0  ;;  %s416_s6 = smov 0   ;;  %s418_s7 = smov 0  }
   0x2   :  { %s420_s8 = smov 0   ;;  %s422_s9 = smov 0  }
   0x3   :  { %s424_s10 = smov 0   ;;  %s426_s11 = smov 0  }
   0x4 LB: > { %s256_s12 = sadd.s32 4294967295, %s403_s11   ;;  %s26_s13 = sadd.s32 1, %s399_s10  ;;  %s403_s11 = sphi %s426_s11, %s14_s11   ;;  %s399_s10 = sphi %s424_s10, %s525_s10   ;;  %s395_s9 = sphi %s422_s9, %s524_s9   ;;  %s391_s8 = sphi %s420_s8, %s523_s8   ;;  %s387_s7 = sphi %s418_s7, %s522_s7   ;;  %s383_s6 = sphi %s416_s6, %s521_s6  }
   0x5   : > { %p28_p0 = scmp.ge.s32.totalorder %s26_s13, 2  ;;  %s35_s14 = sadd.s32 1, %s391_s8 }
   0x6   : > { %p42_p1 = scmp.ne.s32.totalorder %s391_s8, %s387_s7  ;;  %p43_p2 = scmp.eq.s32.totalorder %s403_s11, 0 }
   0x7   : > { %s527_s13 = smov (%p28_p0, %s26_s13), 0  ;;  %p48_p4 = scmp.ne.s32.totalorder %s387_s7, %s383_s6 }
   0x8   : > { %p452_p3 = por %p43_p2, %p42_p1  ;;  %s30_s16 = ssub.s32 %s399_s10, %s527_s13 }
   0x9   : > { %p49_p5 = scmp.eq.s32.totalorder %s256_s12, 0  ;;  %p33_p6 = scmp.eq.s32.totalorder %s30_s16, 0 }
   0xa   : > { %p275_p8 = scmp.lt.s32.totalorder %s403_s11, 2  ;;  %s100_s19 = sand.u32 1, %s391_s8  }
   0xb   : > { %p459_p7 = por %p49_p5, %p48_p4  ;;  %s268_s20 = sshll.u32 %s399_s10, 7 }
   0xc   : > { %s465_s18 = scalar_select %p33_p6, %s391_s8, %s35_s14  }
   0xd   : > { %s260_s21 = sshll.u32 %s100_s19, 3  ;;  %s112_s24 = scalar_lea.hbm %s516_s0, %s268_s20 }
   0xe   : > { %s104_s25 = scalar_lea.vmem [#allocation2], %s260_s21  ;;  %p474_p9 = pnand %p275_p8, %p452_p3 }
   0xf   : > { %s114_s26 = sshll.u32 %s104_s25, 4  ;;  %p263_p10 = scmp.ge.s32.totalorder %s403_s11, 1  ;;  %s115_s26 = int_to_ptr.vmem [resolvable:$true] %s114_s26 }
  0x10   : > { %p119_p11 = scmp.lt.s32.totalorder %s403_s11, 3  ;;  %s101_s28 = scalar_lea.sflag [#allocation3], %s100_s19 }
  0x11   : > { %p327_p12 = pneg %p474_p9  ;;  %s338_s29 = scalar_lea.vmem %s115_s26, 128 }
  0x12   : > { %p339_p13 = scmp.ne.s32.totalorder %s115_s26, %s338_s29  ;;  %s405_s30 = smov [#allocation2]  }
  0x13   : > { %s343_s2 = sshll.u32 %s405_s30, 4  ;;  %s344_s2 = int_to_ptr.vmem [resolvable:$false] %s343_s2 }
  0x14   : > { %p341_p0 = pnand %p339_p13, %p327_p12  ;;  %s345_s3 = scalar_lea.vmem %s344_s2, 256 }
  0x15   : > { %p346_p2 = scmp.lt.s32.totalorder %s115_s26, %s344_s2  ;;  %p347_p3 = scmp.lt.s32.totalorder %s345_s3, %s338_s29 }
  0x16   : > { %p342_p1 = pneg %p341_p0 }
  0x17   : > { %p348_p4 = por %p347_p3, %p346_p2 }
  0x19   : > { %p349_p5 = pnand %p348_p4, %p342_p1 }
  0x1b   : > { %352 = shalt.err (!%p349_p5)
}
  0x1c   : > { %274 = dma.hbm_to_vmem [thread:$0]  (!%p474_p9), %s112_s24, 128, %s115_s26, %s101_s28  }
  0x1d   : > { %p120_p6 = pnand %p263_p10, %p119_p11 }
  0x1e   : > { %s125_s4 = sand.u32 (!%p120_p6), 1, %s387_s7  }
  0x1f   : > { %123 = sbr.rel (%p120_p6) target bundleno = 182 (0xb6), region = 24  ;;  %s264_s5 = sshll.u32 (!%p120_p6), %s125_s4, 3 }
  0x20   : > { %s126_s6 = scalar_lea.sflag (!%p120_p6), [#allocation3], %s125_s4  ;;  %s129_s12 = scalar_lea.vmem (!%p120_p6), [#allocation2], %s264_s5 }
  0x24   : > { %378 = dma.done.wait (%p459_p7), %s126_s6, 128  }
  0x25   : > { %380 = vsyncadd (%p459_p7), %s126_s6, 4294967168  ;;  %vm162_vm0 = vcmask 1043456   ;;  %v158_v0 = vld [vmem:[%s129_s12] sm:$0xff]  ;;  %p151_p8 = scmp.lt.s32.totalorder %s395_s9, 1  ;;  %vm168_vm1 = vcmask 3072  }
  0x26   : > { %v160_v1 = vcombine.high %v158_v0, %v158_v0  ;;  %v163_v2 = vsel %vm162_vm0, %v158_v0, 0.0 }
  0x27   : > { %s529_s9 = smov (!%p151_p8, %s395_s9), 1 }
  0x28   : > { %v164_v3 = vsel %vm162_vm0, %v160_v1, 0.0  ;;  %s265_s14 = sshll.u32 %s529_s9, 2 }
  0x29   : > { %v165_v4 = vadd.f32 %v164_v3, %v163_v2  ;;  %s157_s19 = scalar_lea.vmem %s517_s1, %s265_s14 }
  0x2b   : > { %166 = vadd.xlane.f32.xlu0 %v165_v4 }
  0xb4   : > { %v167_v5 = vpop.xlane.xlu0 %166 }
  0xb5   : > { %169 = vst.msk [vmem:[%s157_s19] sm:$0xf] %vm168_vm1, %v167_v5 }
  0xb6 PF: > { %s14_s11 = sadd.s32 1, %s403_s11   ;;  %s521_s6 = smov %s387_s7 }
  0xb7   : > { %p11_p7 = scmp.ge.s32.totalorder %s14_s11, 4   ;;  %s522_s7 = smov %s391_s8 }
  0xb8   : > { %s523_s8 = smov %s465_s18  ;;  %s524_s9 = smov %s399_s10 }
  0xb9   : > { %s525_s10 = smov %s527_s13  ;;  %13 = sbr.rel (!%p11_p7) target bundleno = 4 (0x4), region = 64 }
  0xbe   :  { %195 = vsyncpa [#allocation3], 1 }
  0xbf   :  { %197 = vsyncpa [#allocation3 + $0x1], 1 }

</bundles_post_ra>
